<compile_context>
chip_gen: v5e
topology: v5e:2x2
jax: 0.10.0
libtpu: 0.0.40
codegen_flags: <defaults>
</compile_context>

<pallas_src>
import functools

import jax
import jax.numpy as jnp
from jax.experimental import pallas as pl
from jax.experimental.pallas import tpu as pltpu

EPS = 1e-6


def _round_up(a, m):
    return ((a + m - 1) // m) * m


def _vmem_capacity_bytes():
    """Physical VMEM per TensorCore; conservative fallback if query fails."""
    try:
        info = pltpu.get_tpu_info()
        for name in ("vmem_capacity_bytes", "vmem_bytes", "vmem_size_bytes"):
            v = getattr(info, name, None)
            if v:
                return int(v)
    except Exception:
        pass
    return 64 * 1024 * 1024  # v7x per-TC size (smallest of v5e/v6e/v7x)


def _ffn_kernel(e_true, x_ref, res_ref, w1_ref, b1_ref, w2_ref, b2_ref,
                scale_ref, shift_ref, o_ref, acc_ref):
    """One (row-tile, H-block) grid step. Axis 1 (H) is the reduction axis."""
    k = pl.program_id(1)

    @pl.when(k == 0)
    def _init():
        # Fold residual + b2 into the accumulator init; these adds overlap with
        # the pipeline instead of sitting in the serial epilogue.
        acc_ref[...] = (res_ref[...].astype(jnp.float32)
                        + b2_ref[...].astype(jnp.float32))

    # Matmuls on native-dtype operands, f32 accumulation on the MXU.
    h = jnp.dot(x_ref[...], w1_ref[...], preferred_element_type=jnp.float32)
    h = jnp.maximum(h + b1_ref[...].astype(jnp.float32), 0.0)  # max(0,.)+ReLU == ReLU
    acc_ref[...] += jnp.dot(h.astype(w2_ref.dtype), w2_ref[...],
                            preferred_element_type=jnp.float32)

    @pl.when(k == pl.num_programs(1) - 1)
    def _finalize():
        z = acc_ref[...]                                    # (tm, Ep)
        # Padded feature lanes of z are exactly 0 (inputs/weights/biases are
        # zero-padded), so one-pass unmasked sums give the correct stats.
        inv_e = 1.0 / e_true
        s1 = jnp.sum(z, axis=-1, keepdims=True)
        s2 = jnp.sum(z * z, axis=-1, keepdims=True)
        mean = s1 * inv_e
        var = (s2 - e_true * mean * mean) * (1.0 / (e_true - 1))  # unbiased
        std = jnp.sqrt(jnp.maximum(var, 0.0))
        div = std + EPS + shift_ref[...].astype(jnp.float32)      # shift in denom
        d = z - mean
        o_ref[...] = (scale_ref[...].astype(jnp.float32) * d / div).astype(o_ref.dtype)


def position_wise_feed_forward(x, residual_x, w1, b1, w2, b2, scale, shift,
                               *, tm=None, th=None):
    """x, residual_x: (B, S, E); w1: (E, H); w2: (H, E). Returns (B, S, E)."""
    B, S, E = x.shape
    H = w1.shape[1]
    N = B * S
    itemsize = jnp.dtype(x.dtype).itemsize

    # Lane-dense padding of feature dims to multiples of 128.
    Ep = _round_up(E, 128)
    Hp = _round_up(H, 128)
    Np0 = _round_up(N, 8)

    # --- VMEM budget (per generation) -------------------------------------
    phys_vmem = _vmem_capacity_bytes()
    budget = int(phys_vmem * 0.80)          # headroom for compiler internals

    def vmem_needed(tm_, th_):
        act = 3 * 2 * tm_ * Ep * itemsize           # x, res, out double-buffered
        wts = 2 * 2 * Ep * th_ * itemsize           # W1 + W2 blocks, double-buffered
        small = 4 * (th_ + 3 * Ep) * itemsize       # b1, b2, scale, shift
        acc = tm_ * Ep * 4                          # f32 accumulator scratch
        hbuf = tm_ * th_ * (4 + itemsize)           # h intermediate + cast copy
        return act + wts + small + acc + hbuf

    # --- Row-tile selection (avoid ghost rows; keep >=2 tiles for megacore) --
    if tm is None:
        tm = 512
    tm = max(8, min(_round_up(tm, 8), Np0))
    if Np0 >= 16 and _round_up(Np0, tm) // tm < 2:
        tm = _round_up(pl.cdiv(Np0, 2), 8)
    # shrink tm if even a single-128 H block would not fit
    while tm > 8 and vmem_needed(tm, 128) > budget:
        tm = max(8, tm // 2)
    Np = _round_up(Np0, tm)

    # --- Hidden-dim blocking: prefer fully VMEM-resident weights ------------
    if th is None:
        if vmem_needed(tm, Hp) <= budget:
            th = Hp                                  # weights resident, k axis == 1
        else:
            th = 128
            for cand in (4096, 2048, 1024, 512, 256, 128):
                if cand <= Hp and vmem_needed(tm, cand) <= budget:
                    th = cand
                    break
    th = min(th, Hp)
    Hp = _round_up(Hp, th)

    def pad2(a, r, c):
        return jnp.pad(a, ((0, r - a.shape[0]), (0, c - a.shape[1])))

    x2 = pad2(x.reshape(N, E), Np, Ep)
    r2 = pad2(residual_x.reshape(N, E), Np, Ep)
    w1p = pad2(w1, Ep, Hp)
    w2p = pad2(w2, Hp, Ep)
    b1p = jnp.pad(b1, (0, Hp - H)).reshape(1, Hp)
    b2p = jnp.pad(b2, (0, Ep - E)).reshape(1, Ep)
    scp = jnp.pad(scale, (0, Ep - E)).reshape(1, Ep)
    shp = jnp.pad(shift, (0, Ep - E)).reshape(1, Ep)

    row_tiles = Np // tm
    k_tiles = Hp // th
    grid = (row_tiles, k_tiles)

    # Weight HBM traffic: fetched once when resident (k_tiles == 1, constant
    # block index), otherwise re-streamed once per row tile.
    weight_passes = 1 if k_tiles == 1 else row_tiles
    cost = pl.CostEstimate(
        flops=4 * N * E * H,
        transcendentals=0,
        bytes_accessed=(3 * Np * Ep
                        + weight_passes * 2 * Ep * Hp
                        + Hp + 3 * Ep) * itemsize,
    )

    out = pl.pallas_call(
        functools.partial(_ffn_kernel, E),
        out_shape=jax.ShapeDtypeStruct((Np, Ep), x.dtype),
        grid_spec=pltpu.PrefetchScalarGridSpec(
            num_scalar_prefetch=0,
            grid=grid,
            in_specs=[
                pl.BlockSpec((tm, Ep), lambda i, k: (i, 0)),   # x (const across k)
                pl.BlockSpec((tm, Ep), lambda i, k: (i, 0)),   # residual
                pl.BlockSpec((Ep, th), lambda i, k: (0, k)),   # W1 (resident if k_tiles==1)
                pl.BlockSpec((1, th),  lambda i, k: (0, k)),   # b1
                pl.BlockSpec((th, Ep), lambda i, k: (k, 0)),   # W2 (resident if k_tiles==1)
                pl.BlockSpec((1, Ep),  lambda i, k: (0, 0)),   # b2
                pl.BlockSpec((1, Ep),  lambda i, k: (0, 0)),   # scale
                pl.BlockSpec((1, Ep),  lambda i, k: (0, 0)),   # shift
            ],
            out_specs=pl.BlockSpec((tm, Ep), lambda i, k: (i, 0)),
            scratch_shapes=[pltpu.VMEM((tm, Ep), jnp.float32)],
        ),
        compiler_params=pltpu.CompilerParams(
            dimension_semantics=("parallel", "arbitrary"),
            vmem_limit_bytes=budget,
        ),
        cost_estimate=cost,
    )(x2, r2, w1p, b1p, w2p, b2p, scp, shp)

    return out[:N, :E].reshape(B, S, E)


def _init_params(key, embed_dim, hidden_dim, dtype=jnp.float32):
    """Deterministic init mimicking nn.Linear defaults (uniform +-1/sqrt(fan_in))."""
    k1, k2, k3, k4 = jax.random.split(key, 4)
    bound1 = 1.0 / (embed_dim ** 0.5)
    bound2 = 1.0 / (hidden_dim ** 0.5)
    w1 = jax.random.uniform(k1, (embed_dim, hidden_dim), dtype, -bound1, bound1)
    b1 = jax.random.uniform(k2, (hidden_dim,), dtype, -bound1, bound1)
    w2 = jax.random.uniform(k3, (hidden_dim, embed_dim), dtype, -bound2, bound2)
    b2 = jax.random.uniform(k4, (embed_dim,), dtype, -bound2, bound2)
    scale = jnp.ones((embed_dim,), dtype)    # LayerNorm.scale init
    shift = jnp.zeros((embed_dim,), dtype)   # LayerNorm.shift init
    return w1, b1, w2, b2, scale, shift


if __name__ == "__main__":
    B, S, E, H = 2, 8, 32, 64

    key = jax.random.PRNGKey(0)
    kx, kr, kp = jax.random.split(key, 3)
    x = jax.random.normal(kx, (B, S, E), jnp.float32)
    residual_x = jax.random.normal(kr, (B, S, E), jnp.float32)
    w1, b1, w2, b2, scale, shift = _init_params(kp, E, H)

    out = position_wise_feed_forward(x, residual_x, w1, b1, w2, b2, scale, shift)
    out = jax.block_until_ready(out)

    # plain-JAX reference (same quirky math)
    h_ref = jnp.maximum(x.reshape(-1, E) @ w1 + b1, 0.0)
    y_ref = h_ref @ w2 + b2
    z_ref = y_ref + residual_x.reshape(-1, E)
    mean = z_ref.mean(-1, keepdims=True)
    std = jnp.sqrt(((z_ref - mean) ** 2).sum(-1, keepdims=True) / (E - 1))
    ref = (scale * (z_ref - mean) / (std + EPS + shift)).reshape(B, S, E)

    err = float(jnp.max(jnp.abs(out - ref)))
    assert jnp.allclose(out, ref, atol=1e-3, rtol=1e-3), f"max abs err = {err}"

    print("KERNEL_OK")
</pallas_src>

<mosaic_0001>
module attributes {stable_mosaic.version = 11 : i64} {
  func.func @_ffn_kernel(%arg0: i32, %arg1: i32, %arg2: memref<8x128xf32, #tpu.memory_space<vmem>>, %arg3: memref<8x128xf32, #tpu.memory_space<vmem>>, %arg4: memref<128x128xf32, #tpu.memory_space<vmem>>, %arg5: memref<1x128xf32, #tpu.memory_space<vmem>>, %arg6: memref<128x128xf32, #tpu.memory_space<vmem>>, %arg7: memref<1x128xf32, #tpu.memory_space<vmem>>, %arg8: memref<1x128xf32, #tpu.memory_space<vmem>>, %arg9: memref<1x128xf32, #tpu.memory_space<vmem>>, %arg10: memref<8x128xf32, #tpu.memory_space<vmem>>, %arg11: memref<8x128xf32, #tpu.memory_space<vmem>>) attributes {dimension_semantics = [#tpu.dimension_semantics<parallel>, #tpu.dimension_semantics<arbitrary>], iteration_bounds = array<i64: 2, 1>, scalar_prefetch = 0 : i64, scratch_operands = 1 : i64, tpu.core_type = #tpu.core_type<tc>, window_params = [{transform_indices = @transform_0, window_bounds = array<i64: 8, 128>}, {transform_indices = @transform_1, window_bounds = array<i64: 8, 128>}, {transform_indices = @transform_2, window_bounds = array<i64: 128, 128>}, {transform_indices = @transform_3, window_bounds = array<i64: 1, 128>}, {transform_indices = @transform_4, window_bounds = array<i64: 128, 128>}, {pipeline_mode = #tpu.pipeline_mode<synchronous>, transform_indices = @transform_5, window_bounds = array<i64: 1, 128>}, {pipeline_mode = #tpu.pipeline_mode<synchronous>, transform_indices = @transform_6, window_bounds = array<i64: 1, 128>}, {pipeline_mode = #tpu.pipeline_mode<synchronous>, transform_indices = @transform_7, window_bounds = array<i64: 1, 128>}, {transform_indices = @transform_8, window_bounds = array<i64: 8, 128>}]} {
    %c0_i32 = arith.constant 0 : i32
    %0 = arith.cmpi eq, %arg1, %c0_i32 : i32
    %1 = arith.extui %0 : i1 to i32
    %c0_i32_0 = arith.constant 0 : i32
    %2 = arith.cmpi ne, %1, %c0_i32_0 : i32
    scf.if %2 {
      %c0_16 = arith.constant 0 : index
      %c0_17 = arith.constant 0 : index
      %19 = vector.load %arg3[%c0_16, %c0_17] : memref<8x128xf32, #tpu.memory_space<vmem>>, vector<8x128xf32>
      %c0_18 = arith.constant 0 : index
      %c0_19 = arith.constant 0 : index
      %20 = vector.load %arg7[%c0_18, %c0_19] : memref<1x128xf32, #tpu.memory_space<vmem>>, vector<1x128xf32>
      %21 = vector.broadcast %20 : vector<1x128xf32> to vector<8x128xf32>
      %22 = arith.addf %19, %21 : vector<8x128xf32>
      %c0_20 = arith.constant 0 : index
      %c0_21 = arith.constant 0 : index
      %23 = vector.load %arg11[%c0_20, %c0_21] : memref<8x128xf32, #tpu.memory_space<vmem>>, vector<8x128xf32>
      tpu.vector_store %arg11[%c0_20, %c0_21], %22 {strides = array<i32>} : memref<8x128xf32, #tpu.memory_space<vmem>>, vector<8x128xf32>,
    } else {
    }
    %c0 = arith.constant 0 : index
    %c0_1 = arith.constant 0 : index
    %3 = vector.load %arg2[%c0, %c0_1] : memref<8x128xf32, #tpu.memory_space<vmem>>, vector<8x128xf32>
    %c0_2 = arith.constant 0 : index
    %c0_3 = arith.constant 0 : index
    %4 = vector.load %arg4[%c0_2, %c0_3] : memref<128x128xf32, #tpu.memory_space<vmem>>, vector<128x128xf32>
    %cst = arith.constant dense<0.000000e+00> : vector<8x128xf32>
    %5 = tpu.matmul %3, %4, %cst {dimension_numbers = #tpu.dot_dimension_numbers<[1], [0], [0], [1], [0, 0, 1, 1], [], []>} : vector<8x128xf32>, vector<128x128xf32>, vector<8x128xf32> -> vector<8x128xf32>
    %c0_4 = arith.constant 0 : index
    %c0_5 = arith.constant 0 : index
    %6 = vector.load %arg5[%c0_4, %c0_5] : memref<1x128xf32, #tpu.memory_space<vmem>>, vector<1x128xf32>
    %7 = vector.broadcast %6 : vector<1x128xf32> to vector<8x128xf32>
    %8 = arith.addf %5, %7 : vector<8x128xf32>
    %cst_6 = arith.constant 0.000000e+00 : f32
    %9 = vector.broadcast %cst_6 : f32 to vector<8x128xf32>
    %10 = arith.maximumf %8, %9 : vector<8x128xf32>
    %c0_7 = arith.constant 0 : index
    %c0_8 = arith.constant 0 : index
    %11 = vector.load %arg11[%c0_7, %c0_8] : memref<8x128xf32, #tpu.memory_space<vmem>>, vector<8x128xf32>
    %c0_9 = arith.constant 0 : index
    %c0_10 = arith.constant 0 : index
    %12 = vector.load %arg6[%c0_9, %c0_10] : memref<128x128xf32, #tpu.memory_space<vmem>>, vector<128x128xf32>
    %cst_11 = arith.constant dense<0.000000e+00> : vector<8x128xf32>
    %13 = tpu.matmul %10, %12, %cst_11 {dimension_numbers = #tpu.dot_dimension_numbers<[1], [0], [0], [1], [0, 0, 1, 1], [], []>} : vector<8x128xf32>, vector<128x128xf32>, vector<8x128xf32> -> vector<8x128xf32>
    %14 = arith.addf %11, %13 : vector<8x128xf32>
    %c0_12 = arith.constant 0 : index
    %c0_13 = arith.constant 0 : index
    %15 = vector.load %arg11[%c0_12, %c0_13] : memref<8x128xf32, #tpu.memory_space<vmem>>, vector<8x128xf32>
    tpu.vector_store %arg11[%c0_12, %c0_13], %14 {strides = array<i32>} : memref<8x128xf32, #tpu.memory_space<vmem>>, vector<8x128xf32>,
    %c0_i32_14 = arith.constant 0 : i32
    %16 = arith.cmpi eq, %arg1, %c0_i32_14 : i32
    %17 = arith.extui %16 : i1 to i32
    %c0_i32_15 = arith.constant 0 : i32
    %18 = arith.cmpi ne, %17, %c0_i32_15 : i32
    scf.if %18 {
      %c0_16 = arith.constant 0 : index
      %c0_17 = arith.constant 0 : index
      %19 = vector.load %arg11[%c0_16, %c0_17] : memref<8x128xf32, #tpu.memory_space<vmem>>, vector<8x128xf32>
      %cst_18 = arith.constant dense<0.000000e+00> : vector<8xf32>
      %20 = vector.multi_reduction <add>, %19, %cst_18 [1] : vector<8x128xf32> to vector<8xf32>
      %21 = vector.shape_cast %20 : vector<8xf32> to vector<8x1xf32>
      %22 = arith.mulf %19, %19 : vector<8x128xf32>
      %cst_19 = arith.constant dense<0.000000e+00> : vector<8xf32>
      %23 = vector.multi_reduction <add>, %22, %cst_19 [1] : vector<8x128xf32> to vector<8xf32>
      %24 = vector.shape_cast %23 : vector<8xf32> to vector<8x1xf32>
      %cst_20 = arith.constant 3.125000e-02 : f32
      %25 = vector.broadcast %cst_20 : f32 to vector<8x1xf32>
      %26 = arith.mulf %21, %25 : vector<8x1xf32>
      %cst_21 = arith.constant 3.200000e+01 : f32
      %27 = vector.broadcast %cst_21 : f32 to vector<8x1xf32>
      %28 = arith.mulf %27, %26 : vector<8x1xf32>
      %29 = arith.mulf %28, %26 : vector<8x1xf32>
      %30 = arith.subf %24, %29 : vector<8x1xf32>
      %cst_22 = arith.constant 0.0322580636 : f32
      %31 = vector.broadcast %cst_22 : f32 to vector<8x1xf32>
      %32 = arith.mulf %30, %31 : vector<8x1xf32>
      %cst_23 = arith.constant 0.000000e+00 : f32
      %33 = vector.broadcast %cst_23 : f32 to vector<8x1xf32>
      %34 = arith.maximumf %32, %33 : vector<8x1xf32>
      %35 = math.sqrt %34 : vector<8x1xf32>
      %cst_24 = arith.constant 9.99999997E-7 : f32
      %36 = vector.broadcast %cst_24 : f32 to vector<8x1xf32>
      %37 = arith.addf %35, %36 : vector<8x1xf32>
      %c0_25 = arith.constant 0 : index
      %c0_26 = arith.constant 0 : index
      %38 = vector.load %arg9[%c0_25, %c0_26] : memref<1x128xf32, #tpu.memory_space<vmem>>, vector<1x128xf32>
      %39 = vector.broadcast %37 : vector<8x1xf32> to vector<8x128xf32>
      %40 = vector.broadcast %38 : vector<1x128xf32> to vector<8x128xf32>
      %41 = arith.addf %39, %40 : vector<8x128xf32>
      %42 = vector.broadcast %26 : vector<8x1xf32> to vector<8x128xf32>
      %43 = arith.subf %19, %42 : vector<8x128xf32>
      %c0_27 = arith.constant 0 : index
      %c0_28 = arith.constant 0 : index
      %44 = vector.load %arg8[%c0_27, %c0_28] : memref<1x128xf32, #tpu.memory_space<vmem>>, vector<1x128xf32>
      %45 = vector.broadcast %44 : vector<1x128xf32> to vector<8x128xf32>
      %46 = arith.mulf %45, %43 : vector<8x128xf32>
      %47 = arith.divf %46, %41 : vector<8x128xf32>
      %c0_29 = arith.constant 0 : index
      %c0_30 = arith.constant 0 : index
      %48 = vector.load %arg10[%c0_29, %c0_30] : memref<8x128xf32, #tpu.memory_space<vmem>>, vector<8x128xf32>
      tpu.vector_store %arg10[%c0_29, %c0_30], %47 {strides = array<i32>} : memref<8x128xf32, #tpu.memory_space<vmem>>, vector<8x128xf32>,
    } else {
    }
    return
  }
  func.func @transform_0(%arg0: i32, %arg1: i32) -> (i32, i32) {
    %c0_i32 = arith.constant 0 : i32
    %c0_i32_0 = arith.constant 0 : i32
    return %arg0, %c0_i32 : i32, i32
  }
  func.func @transform_1(%arg0: i32, %arg1: i32) -> (i32, i32) {
    %c0_i32 = arith.constant 0 : i32
    %c0_i32_0 = arith.constant 0 : i32
    return %arg0, %c0_i32 : i32, i32
  }
  func.func @transform_2(%arg0: i32, %arg1: i32) -> (i32, i32) {
    %c0_i32 = arith.constant 0 : i32
    %c0_i32_0 = arith.constant 0 : i32
    return %c0_i32, %arg1 : i32, i32
  }
  func.func @transform_3(%arg0: i32, %arg1: i32) -> (i32, i32) {
    %c0_i32 = arith.constant 0 : i32
    %c0_i32_0 = arith.constant 0 : i32
    return %c0_i32, %arg1 : i32, i32
  }
  func.func @transform_4(%arg0: i32, %arg1: i32) -> (i32, i32) {
    %c0_i32 = arith.constant 0 : i32
    %c0_i32_0 = arith.constant 0 : i32
    return %arg1, %c0_i32 : i32, i32
  }
  func.func @transform_5(%arg0: i32, %arg1: i32) -> (i32, i32) {
    %c0_i32 = arith.constant 0 : i32
    %c0_i32_0 = arith.constant 0 : i32
    %c0_i32_1 = arith.constant 0 : i32
    return %c0_i32, %c0_i32_0 : i32, i32
  }
  func.func @transform_6(%arg0: i32, %arg1: i32) -> (i32, i32) {
    %c0_i32 = arith.constant 0 : i32
    %c0_i32_0 = arith.constant 0 : i32
    %c0_i32_1 = arith.constant 0 : i32
    return %c0_i32, %c0_i32_0 : i32, i32
  }
  func.func @transform_7(%arg0: i32, %arg1: i32) -> (i32, i32) {
    %c0_i32 = arith.constant 0 : i32
    %c0_i32_0 = arith.constant 0 : i32
    %c0_i32_1 = arith.constant 0 : i32
    return %c0_i32, %c0_i32_0 : i32, i32
  }
  func.func @transform_8(%arg0: i32, %arg1: i32) -> (i32, i32) {
    %c0_i32 = arith.constant 0 : i32
    %c0_i32_0 = arith.constant 0 : i32
    return %arg0, %c0_i32 : i32, i32
  }
}

</mosaic_0001>

<bundles_post_ra>
// kernel: tpu_custom_call.1
= control target key start
LH: loop header
LB: loop body
LE: loop exit
PB: predicated region body
PF: predicated region fallthrough
CT: control target
= control target key end

     0   :  { %s1300_s0 = inlined_call_operand.hbm [shape: f32[16,128], index: 0, kind: input, shape index: {}]   ;;  %s1301_s1 = inlined_call_operand.hbm [shape: f32[16,128], index: 1, kind: input, shape index: {}]   ;;  %s1302_s2 = inlined_call_operand.hbm [shape: f32[128,128], index: 2, kind: input, shape index: {}]   ;;  %s1303_s3 = inlined_call_operand.vmem [shape: f32[1,128], index: 3, kind: input, shape index: {}]   ;;  %s1304_s4 = inlined_call_operand.hbm [shape: f32[128,128], index: 4, kind: input, shape index: {}]   ;;  %s1305_s5 = inlined_call_operand.vmem [shape: f32[1,128], index: 5, kind: input, shape index: {}]   ;;  %s1306_s6 = inlined_call_operand.vmem [shape: f32[1,128], index: 6, kind: input, shape index: {}]   ;;  %s1307_s7 = inlined_call_operand.vmem [shape: f32[1,128], index: 7, kind: input, shape index: {}]   ;;  %s1308_s8 = inlined_call_operand.hbm [shape: f32[16,128], index: 8, kind: output, shape index: {}]  }
   0x1   :  { %1316 = sst [smem:[#allocation24_spill]] %s1302_s2 }
   0x2   :  { %1317 = sst [smem:[#allocation25_spill]] %s1304_s4 }
   0x3   :  { %13 = vsyncpa [#allocation4], 0 }
   0x4   :  { %15 = vsyncpa [#allocation4 + $0x1], 0 }
   0x5   :  { %16 = vsyncpa [#allocation7], 0 }
   0x6   :  { %18 = vsyncpa [#allocation7 + $0x1], 0 }
   0x7   :  { %19 = vsyncpa [#allocation10], 0 }
   0x8   :  { %20 = vsyncpa [#allocation5], 0 }
   0x9   :  { %22 = vsyncpa [#allocation5 + $0x1], 0  ;;  %s1120_s27 = smov 0   ;;  %s1122_s28 = smov 0  }
   0xa   :  { %s1124_s29 = smov 0   ;;  %s1126_s30 = smov 0  }
   0xb   :  { %s1128_s9 = smov 0   ;;  %s1130_s10 = smov 0  }
   0xc LB: > { %1318 = sst [smem:[#allocation17_spill]] %s1049_s27  ;;  %s1151_s11 = sadd.s32 4294967295, %s1069_s10   ;;  %s1069_s10 = sphi %s1130_s10, %s28_s10   ;;  %s1065_s9 = sphi %s1128_s9, %s1338_s9   ;;  %s1061_s30 = sphi %s1126_s30, %s1337_s30   ;;  %s1057_s29 = sphi %s1124_s29, %s1336_s29   ;;  %s1053_s28 = sphi %s1122_s28, %s1340_s28   ;;  %s1049_s27 = sphi %s1120_s27, %s1339_s27  }
   0xd   : > { %1319 = sst [smem:[#allocation18_spill]] %s1057_s29  ;;  %p738_p0 = scmp.ge.s32.totalorder %s1069_s10, 1 }
   0xe   : > { %1320 = sst [smem:[#allocation19_spill]] %s1065_s9  ;;  %p61_p1 = scmp.eq.s32.totalorder %s1151_s11, 0 }
   0xf   : > { %p264_p2 = scmp.lt.s32.totalorder %s1069_s10, 3  ;;  %s1321_s2 = sld [smem:[#allocation24_spill]] }
  0x10   : > { %s1071_s16 = smov [#allocation8]   ;;  %p742_p6 = scmp.ge.s32.totalorder %s1069_s10, 2 }
  0x11   : > { %p1159_p3 = pnand %p738_p0, %p264_p2  ;;  %s279_s17 = sshll.u32 %s1071_s16, 4  ;;  %s280_s17 = int_to_ptr.vmem [resolvable:$true] %s279_s17 }
  0x12   : > { %s1323_s4 = sld [smem:[#allocation25_spill]]  ;;  %s1072_s21 = smov 128  }
  0x13   : > { %p771_p4 = pneg %p1159_p3  ;;  %s1073_s22 = smov 8  }
  0x14   : > { %s1074_s23 = smov [#allocation9]   ;;  %s737_s25 = sadd.s32 4294967294, %s1069_s10  }
  0x15   : > { %s277_s14 = sshll.u32 %s1321_s2, 4  ;;  %p772_p5 = pnand %p771_p4, %p61_p1  ;;  %s278_s14 = int_to_ptr.hbm [resolvable:$true] %s277_s14 }
  0x16   : > { %s302_s24 = sshll.u32 %s1074_s23, 4  ;;  %s40_s26 = sadd.s32 1, %s1065_s9  ;;  %s303_s24 = int_to_ptr.vmem [resolvable:$true] %s302_s24 }
  0x17   : > { %774 = dma.hbm_to_vmem [thread:$0]  (!%p772_p5), %s278_s14, 2048, %s280_s17, [#allocation7], %s1072_s21, %s1072_s21, %s1073_s22  }
  0x18   : > { %s300_s20 = sshll.u32 %s1323_s4, 4  ;;  %p42_p7 = scmp.ge.s32.totalorder %s40_s26, 2  ;;  %s301_s20 = int_to_ptr.hbm [resolvable:$true] %s300_s20 }
  0x19   : > { %777 = dma.hbm_to_vmem [thread:$0]  (!%p772_p5), %s301_s20, 2048, %s303_s24, [#allocation10], %s1072_s21, %s1072_s21, %s1073_s22  }
  0x1a   : > { %s47_s12 = sadd.s32 1, %s1057_s29  ;;  %p54_p8 = scmp.ne.s32.totalorder %s1057_s29, %s1053_s28 }
  0x1b   : > { %p55_p9 = scmp.eq.s32.totalorder %s1069_s10, 0  ;;  %s1342_s26 = smov (%p42_p7, %s40_s26), 0 }
  0x1c   : > { %1324 = sst [smem:[#allocation20_spill]] %s1342_s26  ;;  %p60_p11 = scmp.ne.s32.totalorder %s1053_s28, %s1049_s27 }
  0x1d   : > { %p1179_p10 = por %p55_p9, %p54_p8  ;;  %s44_s14 = ssub.s32 %s1065_s9, %s1342_s26 }
  0x1e   : > { %p251_p12 = scmp.eq.s32.totalorder %s1151_s11, 1  ;;  %p45_p13 = scmp.eq.s32.totalorder %s44_s14, 0 }
  0x1f   : > { %p1190_p0 = por %p61_p1, %p60_p11  ;;  %p257_p4 = scmp.eq.s32.totalorder %s737_s25, 1 }
  0x20   : > { %p1194_p2 = por %p251_p12, %p54_p8  ;;  %p791_p7 = scmp.lt.s32.totalorder %s1069_s10, 2 }
  0x21   : > { %s1199_s18 = scalar_select %p45_p13, %s1057_s29, %s47_s12  }
  0x22   : > { %s1327_s17 = scalar_select %p1194_p2, 1, 0 }
  0x23   : > { %1329 = sst [smem:[#allocation22_spill]] %s1199_s18  ;;  %p1201_p5 = por %p257_p4, %p60_p11 }
  0x24   : > { %1328 = sst [smem:[#allocation21_spill]] %s1327_s17  ;;  %s325_s20 = sand.u32 1, %s1057_s29  }
  0x25   : > { %s1330_s19 = scalar_select %p1201_p5, 1, 0 }
  0x26   : > { %s744_s21 = sshll.u32 %s1065_s9, 3  ;;  %s743_s22 = sshll.u32 %s325_s20, 3 }
  0x27   : > { %1331 = sst [smem:[#allocation23_spill]] %s1330_s19  ;;  %s333_s14 = scalar_lea.hbm %s1300_s0, %s744_s21 }
  0x28   : > { %s335_s2 = sshll.u32 %s333_s14, 4  ;;  %s329_s4 = scalar_lea.vmem [#allocation3], %s743_s22  ;;  %s336_s2 = int_to_ptr.hbm [resolvable:$true] %s335_s2 }
  0x29   : > { %s337_s26 = sshll.u32 %s329_s4, 4  ;;  %p779_p8 = pnand %p791_p7, %p1179_p10  ;;  %s338_s26 = int_to_ptr.vmem [resolvable:$true] %s337_s26 }
  0x2a   : > { %s352_s18 = scalar_lea.hbm %s1301_s1, %s744_s21  ;;  %s344_s19 = sand.u32 1, %s1069_s10  }
  0x2b   : > { %s326_s27 = scalar_lea.sflag [#allocation4], %s325_s20  ;;  %s354_s9 = sshll.u32 %s352_s18, 4  ;;  %s355_s9 = int_to_ptr.hbm [resolvable:$true] %s354_s9 }
  0x2c   : > { %781 = dma.hbm_to_vmem [thread:$0]  (!%p779_p8), %s336_s2, 128, %s338_s26, %s326_s27  }
  0x2d   : > { %s348_s29 = scalar_lea.vmem [#allocation6], %s743_s22  ;;  %s345_s23 = scalar_lea.sflag [#allocation7], %s344_s19 }
  0x2e   : > { %s356_s17 = sshll.u32 %s348_s29, 4  ;;  %365 = sbr.rel (%p1159_p3) target bundleno = 526 (0x20e), region = 52  ;;  %s357_s17 = int_to_ptr.vmem [resolvable:$true] %s356_s17 }
  0x2f   : > { %784 = dma.hbm_to_vmem [thread:$0]  (!%p779_p8), %s355_s9, 128, %s357_s17, %s345_s23  }
  0x30   : > { %s1220_s4 = sand.u32 (!%p1159_p3), 1, %s1053_s28  }
  0x31   : > { %s1223_s13 = sshll.u32 (!%p1159_p3), %s1220_s4, 3  ;;  %s368_s2 = scalar_lea.sflag (!%p1159_p3), [#allocation4], %s1220_s4 }
  0x32   : > { %s371_s27 = scalar_lea.vmem (!%p1159_p3), [#allocation3], %s1223_s13 }
  0x33   : > { %1028 = dma.done.wait (%p1190_p0), %s368_s2, 128  }
  0x34   : > { %1030 = vsyncadd (%p1190_p0), %s368_s2, 4294967168  ;;  %s377_s29 = sand.u32 1, %s1151_s11   ;;  %s381_s15 = scalar_lea.vmem [#allocation6], %s1223_s13 }
  0x35   : > { %s378_s9 = scalar_lea.sflag [#allocation7], %s377_s29 }
  0x36   : > { %1032 = dma.done.wait (%p1190_p0), %s378_s9, 128  }
  0x37   : > { %1034 = vsyncadd (%p1190_p0), %s378_s9, 4294967168 }
  0x38   : > { %1036 = dma.done.wait (%p61_p1), [#allocation7], 2048  }
  0x39   : > { %1038 = vsyncadd (%p61_p1), [#allocation7], 4294965248 }
  0x3a   : > { %1040 = dma.done.wait (%p61_p1), [#allocation10], 2048  }
  0x3b   : > { %1042 = vsyncadd (%p61_p1), [#allocation10], 4294965248  ;;  %v464_v0 = vld [vmem:[#allocation8 + $0x78] sm:$0xff]  ;;  %v463_v1 = vld [vmem:[#allocation8 + $0x70] sm:$0xff]  ;;  %s754_s20 = sshll.u32 %s1061_s30, 3  ;;  %s432_s30 = scalar_lea.vmem [#allocation11], %s1223_s13 }
  0x3c   : > { %469 = vmatpush.msra.mxu0 %v464_v0  ;;  %v462_v2 = vld [vmem:[#allocation8 + $0x68] sm:$0xff]  ;;  %v461_v3 = vld [vmem:[#allocation8 + $0x60] sm:$0xff]  ;;  %v506_v4 = vld [vmem:[#allocation9 + $0x78] sm:$0xff]  ;;  %s595_s25 = scalar_lea.hbm %s1308_s8, %s754_s20  ;;  %s597_s23 = sshll.u32 %s432_s30, 4  ;;  %s598_s23 = int_to_ptr.vmem [resolvable:$true] %s597_s23 }
  0x3d   : > { %v460_v5 = vld [vmem:[#allocation8 + $0x58] sm:$0xff]  ;;  %507 = vmatpush.msra.mxu1 %v506_v4  ;;  %v505_v6 = vld [vmem:[#allocation9 + $0x70] sm:$0xff]  ;;  %v504_v7 = vld [vmem:[#allocation9 + $0x68] sm:$0xff]  ;;  %s599_s2 = sshll.u32 %s595_s25, 4  ;;  %s995_s11 = scalar_lea.hbm %s1308_s8, 16  ;;  %s600_s2 = int_to_ptr.hbm [resolvable:$true] %s599_s2 }
  0x3e   : > { %470 = vmatpush.msra.mxu0 %v463_v1  ;;  %v459_v8 = vld [vmem:[#allocation8 + $0x50] sm:$0xff]  ;;  %v503_v9 = vld [vmem:[#allocation9 + $0x60] sm:$0xff]  ;;  %v458_v10 = vld [vmem:[#allocation8 + $0x48] sm:$0xff]  ;;  %s989_s29 = sshra.s32 %s600_s2, 4  ;;  %s990_s29 = int_to_ptr.hbm [resolvable:$true] %s989_s29 }
  0x3f   : > { %508 = vmatpush.msra.mxu1 %v505_v6  ;;  %v502_v11 = vld [vmem:[#allocation9 + $0x58] sm:$0xff]  ;;  %v457_v12 = vld [vmem:[#allocation8 + $0x40] sm:$0xff]  ;;  %v501_v13 = vld [vmem:[#allocation9 + $0x50] sm:$0xff]  ;;  %s991_s9 = scalar_lea.hbm %s990_s29, 8  ;;  %p996_p10 = scmp.lt.s32.totalorder %s990_s29, %s1308_s8 }
  0x40   : > { %471 = vmatpush.msra.mxu0 %v462_v2  ;;  %v456_v14 = vld [vmem:[#allocation8 + $0x38] sm:$0xff]  ;;  %v500_v15 = vld [vmem:[#allocation9 + $0x48] sm:$0xff]  ;;  %v455_v16 = vld [vmem:[#allocation8 + $0x30] sm:$0xff]  ;;  %p992_p1 = scmp.ne.s32.totalorder %s990_s29, %s991_s9  ;;  %p997_p11 = scmp.lt.s32.totalorder %s995_s11, %s991_s9 }
  0x41   : > { %509 = vmatpush.msra.mxu1 %v504_v7  ;;  %v499_v17 = vld [vmem:[#allocation9 + $0x40] sm:$0xff]  ;;  %v454_v18 = vld [vmem:[#allocation8 + $0x28] sm:$0xff]  ;;  %v498_v19 = vld [vmem:[#allocation9 + $0x38] sm:$0xff] }
  0x42   : > { %472 = vmatpush.msra.mxu0 %v461_v3  ;;  %v453_v20 = vld [vmem:[#allocation8 + $0x20] sm:$0xff]  ;;  %v497_v21 = vld [vmem:[#allocation9 + $0x30] sm:$0xff]  ;;  %v452_v22 = vld [vmem:[#allocation8 + $0x18] sm:$0xff]  ;;  %p993_p3 = pnand %p992_p1, %p1194_p2  ;;  %p998_p12 = por %p997_p11, %p996_p10 }
  0x43   : > { %510 = vmatpush.msra.mxu1 %v503_v9  ;;  %v496_v23 = vld [vmem:[#allocation9 + $0x28] sm:$0xff]  ;;  %v451_v24 = vld [vmem:[#allocation8 + $0x10] sm:$0xff]  ;;  %v495_v25 = vld [vmem:[#allocation9 + $0x20] sm:$0xff] }
  0x44   : > { %473 = vmatpush.msra.mxu0 %v460_v5  ;;  %v450_v26 = vld [vmem:[#allocation8 + $0x8] sm:$0xff]  ;;  %v494_v27 = vld [vmem:[#allocation9 + $0x18] sm:$0xff]  ;;  %v449_v28 = vld [vmem:[#allocation8] sm:$0xff]  ;;  %p994_p9 = pneg %p993_p3 }
  0x45   : > { %511 = vmatpush.msra.mxu1 %v502_v11  ;;  %v448_v29 = vld [vmem:[%s371_s27] sm:$0xff]  ;;  %v493_v30 = vld [vmem:[#allocation9 + $0x10] sm:$0xff]  ;;  %s585_s27 = scalar_lea.sflag [#allocation5], %s1220_s4 }
  0x46   : > { %474 = vmatpush.msra.mxu0 %v459_v8  ;;  %v492_v31 = vld [vmem:[#allocation9 + $0x8] sm:$0xff]  ;;  %v491_v32 = vld [vmem:[#allocation9] sm:$0xff]  ;;  %v441_v38 = vld [vmem:[%s381_s15] sm:$0xff]  ;;  %p999_p13 = pnand %p998_p12, %p994_p9 }
  0x47   : > { %512 = vmatpush.msra.mxu1 %v501_v13  ;;  %v847_v33 = vld [vmem:[%s1303_s3] ss:$0 sm:$0xff] }
  0x48   : > { %475 = vmatpush.msra.mxu0 %v458_v10  ;;  %v848_v37 = vld [vmem:[%s1305_s5] ss:$0 sm:$0xff] }
  0x49   : > { %513 = vmatpush.msra.mxu1 %v500_v15  ;;  %v446_v39 = vadd.f32 %v848_v37, %v441_v38  ;;  %v850_v60 = vld [vmem:[%s1307_s7] ss:$0 sm:$0xff] }
  0x4a   : > { %476 = vmatpush.msra.mxu0 %v457_v12  ;;  %v849_v4 = vld [vmem:[%s1306_s6] ss:$0 sm:$0xff] }
  0x4b   : > { %514 = vmatpush.msra.mxu1 %v499_v17 }
  0x4c   : > { %477 = vmatpush.msra.mxu0 %v456_v14 }
  0x4d   : > { %515 = vmatpush.msra.mxu1 %v498_v19 }
  0x4e   : > { %478 = vmatpush.msra.mxu0 %v455_v16 }
  0x4f   : > { %516 = vmatpush.msra.mxu1 %v497_v21 }
  0x50   : > { %479 = vmatpush.msra.mxu0 %v454_v18 }
  0x51   : > { %517 = vmatpush.msra.mxu1 %v496_v23 }
  0x52   : > { %480 = vmatpush.msra.mxu0 %v453_v20 }
  0x53   : > { %518 = vmatpush.msra.mxu1 %v495_v25 }
  0x54   : > { %481 = vmatpush.msra.mxu0 %v452_v22 }
  0x55   : > { %519 = vmatpush.msra.mxu1 %v494_v27 }
  0x56   : > { %482 = vmatpush.msra.mxu0 %v451_v24 }
  0x57   : > { %520 = vmatpush.msra.mxu1 %v493_v30 }
  0x58   : > { %483 = vmatpush.msra.mxu0 %v450_v26 }
  0x59   : > { %521 = vmatpush.msra.mxu1 %v492_v31 }
  0x5a   : > { %484 = vmatpush.msra.mxu0 %v449_v28 }
  0x5b   : > { %485 = vmatmul.f32.vlgmr.msra.gmra.mxu0 %v448_v29  ;;  %522 = vmatpush.msra.mxu1 %v491_v32 }
  0xd8   : > { %v486_v34 = vpop.f32.mrf.mxu0 }
  0xd9   : > { %v487_v35 = vadd.f32 %v847_v33, %v486_v34 }
  0xdb   : > { %v489_v36 = vmax.f32 %v487_v35, 0.0 }
  0xdd   : > { %523 = vmatmul.f32.vlgmr.msra.gmra.mxu1 %v489_v36 }
 0x15a   : > { %v524_v40 = vpop.f32.mrf.mxu1 }
 0x15b   : > { %v527_v41 = vadd.f32 %v524_v40, %v446_v39 }
 0x15d   : > { %533 = vadd.xlane.f32.xlu0 %v527_v41  ;;  %v535_v42 = vmul.f32 %v527_v41, %v527_v41 }
 0x165   : > { %536 = vadd.xlane.f32.xlu0 %v535_v42 }
 0x1d0   : > { %v534_v43 = vpop.xlane.xlu0 %533 }
 0x1d1   : > { %v538_v44 = vmul.f32 0.03125, %v534_v43 }
 0x1d3   : > { %v539_v45 = vmul.f32 32.0, %v538_v44  ;;  %v562_v5 = vsub.f32 %v527_v41, %v538_v44 }
 0x1d5   : > { %v540_v46 = vmul.f32 %v539_v45, %v538_v44  ;;  %v567_v10 = vmul.f32 %v849_v4, %v562_v5 }
 0x1d8   : > { %v537_v47 = vpop.xlane.xlu0 %536 }
 0x1d9   : > { %v541_v48 = vsub.f32 %v537_v47, %v540_v46 }
 0x1db   : > { %v542_v49 = vmul.f32 0.032258064, %v541_v48 }
 0x1dd   : > { %v543_v50 = vmax.f32 %v542_v49, 0.0 }
 0x1df   : > { %851 = vrsqrt.f32 %v543_v50  ;;  %vm551_vm0 = vcmp.eq.f32.partialorder %v543_v50, inf  ;;  %v554_v58 = vand.u32 2147483648, %v543_v50  ;;  %vm553_vm1 = vcmp.eq.f32.partialorder %v543_v50, 0.0 }
 0x1e5   : > { %v852_v51 = vpop.eup %851 }
 0x1e6   : > { %v545_v52 = vmul.f32 %v852_v51, %v543_v50 }
 0x1e8   : > { %v546_v53 = vmul.f32 %v852_v51, %v545_v52 }
 0x1ea   : > { %v547_v54 = vmul.f32 0.5, %v546_v53 }
 0x1ec   : > { %v548_v55 = vsub.f32 1.5, %v547_v54 }
 0x1ee   : > { %v549_v56 = vmul.f32 %v852_v51, %v548_v55 }
 0x1f0   : > { %v550_v57 = vmul.f32 %v549_v56, %v543_v50 }
 0x1f2   : > { %v552_v59 = vsel %vm551_vm0, %v543_v50, %v550_v57 }
 0x1f3   : > { %v555_v61 = vsel %vm553_vm1, %v554_v58, %v552_v59 }
 0x1f4   : > { %v556_v62 = vadd.f32 1e-06, %v555_v61 }
 0x1f6   : > { %v561_v63 = vadd.f32 %v850_v60, %v556_v62 }
 0x1f8   : > { %853 = vrcp.f32 %v561_v63  ;;  %v579_v3 = vand.u32 2147483648, %v561_v63  ;;  %v577_v7 = vand.u32 2147483647, %v561_v63  ;;  %vm573_vm3 = vweird.f32 %v561_v63 }
 0x1fa   : > { %v580_v9 = vor.u32 1.1754944e-38, %v579_v3  ;;  %vm578_vm5 = vcmp.eq.f32.partialorder %v577_v7, 8.507059e+37 }
 0x1fe   : > { %v854_v0 = vpop.eup %853 }
 0x1ff   : > { %v569_v1 = vmul.f32 %v854_v0, %v561_v63  ;;  %vm574_vm2 = vweird.f32 %v854_v0 }
 0x200   : > { %vm575_vm4 = vmor %vm573_vm3, %vm574_vm2 }
 0x201   : > { %v570_v2 = vsub.f32 1.0, %v569_v1 }
 0x203   : > { %v571_v6 = vmul.f32 %v854_v0, %v570_v2 }
 0x205   : > { %v572_v8 = vadd.f32 %v854_v0, %v571_v6 }
 0x207   : > { %v576_v11 = vsel %vm575_vm4, %v854_v0, %v572_v8 }
 0x208   : > { %v581_v12 = vsel %vm578_vm5, %v580_v9, %v576_v11 }
 0x209   : > { %v582_v13 = vmul.f32 %v581_v12, %v567_v10 }
 0x20b   : > { %583 = vst [vmem:[%s432_s30] sm:$0xff] %v582_v13 }
 0x20c   : > { %1002 = shalt.err (!%p999_p13)
}
 0x20d   : > { %769 = dma.vmem_to_hbm [thread:$0]  (%p1194_p2), %s598_s23, 128, %s600_s2, %s585_s27  }
 0x20e PF: > { %s1333_s4 = sld [smem:[#allocation17_spill]]  ;;  %p786_p0 = pnand %p742_p6, %p1201_p5 }
 0x210   : > { %p787_p4 = pneg %p786_p0 }
 0x214   : > { %s611_s18 = sand.u32 1, %s1333_s4  }
 0x215   : > { %s612_s19 = scalar_lea.sflag [#allocation5], %s611_s18 }
 0x216   : > { %1044 = dma.done.wait (%p787_p4), %s612_s19, 128  }
 0x217   : > { %1046 = vsyncadd (%p787_p4), %s612_s19, 4294967168  ;;  %s28_s10 = sadd.s32 1, %s1069_s10   ;;  %s1335_s20 = sld [smem:[#allocation18_spill]] }
 0x218   : > { %p25_p7 = scmp.ge.s32.totalorder %s28_s10, 4   ;;  %s1336_s29 = sld [smem:[#allocation22_spill]] }
 0x219   : > { %s1337_s30 = sld [smem:[#allocation19_spill]]  ;;  %s1339_s27 = smov %s1053_s28 }
 0x21a   : > { %s1338_s9 = sld [smem:[#allocation20_spill]]  ;;  %27 = sbr.rel (!%p25_p7) target bundleno = 12 (0xc), region = 131 }
 0x21d   : > { %s1340_s28 = smov %s1335_s20 }
 0x21f   :  { %618 = vsyncpa [#allocation4], 1 }
 0x220   :  { %620 = vsyncpa [#allocation4 + $0x1], 1 }
 0x221   :  { %621 = vsyncpa [#allocation7], 1 }
 0x222   :  { %623 = vsyncpa [#allocation7 + $0x1], 1 }
 0x223   :  { %624 = vsyncpa [#allocation10], 1 }
 0x224   :  { %625 = vsyncpa [#allocation5], 1 }
 0x225   :  { %627 = vsyncpa [#allocation5 + $0x1], 1 }

</bundles_post_ra>
